<compile_context>
chip_gen: v7x
topology: tpu7x:2x2x1
jax: 0.10.0
libtpu: 0.0.40
codegen_flags: <defaults>
</compile_context>

<pallas_src>
import jax
import jax.numpy as jnp
from jax.experimental import pallas as pl
from jax.experimental.pallas import tpu as pltpu


def _nc1_cosine_kernel(x_ref, means_ref, labels_ref, n_ref, inv_npow_ref,
                       loss_ref, mu_n_ref, acc_ref):
    b = pl.program_id(0)
    nb = pl.num_programs(0)

    @pl.when(b == 0)
    def _init():
        # Normalize the (small, resident) means rows once; reuse from scratch
        # on every subsequent grid step.
        mu = means_ref[...].astype(jnp.float32)                          # (C, D)
        inv_mu = 1.0 / (jnp.sqrt(jnp.sum(mu * mu, axis=1, keepdims=True)) + 1e-10)
        mu_n_ref[...] = mu * inv_mu
        acc_ref[...] = jnp.zeros_like(acc_ref)

    x = x_ref[...].astype(jnp.float32)                                   # (TB, D)

    # Contract over the last dim of BOTH operands -> pure MXU, no mu^T copy.
    raw = jax.lax.dot_general(
        x, mu_n_ref[...],
        dimension_numbers=(((1,), (1,)), ((), ())),
        preferred_element_type=jnp.float32)                              # (TB, C)

    inv_x = 1.0 / (jnp.sqrt(jnp.sum(x * x, axis=1, keepdims=True)) + 1e-10)  # (TB, 1)

    TB, C = raw.shape
    classes = jax.lax.broadcasted_iota(jnp.int32, (TB, C), 1)
    labels = labels_ref[...]                                             # (TB, 1) int32
    sel = (labels == classes) & (n_ref[...] > 0.0)                       # one-hot & N>0
    masked = jnp.where(sel, 1.0 - raw * inv_x, 0.0)                      # cosine distance

    acc_ref[...] += jnp.sum(masked, axis=0, keepdims=True)               # (1, C) D_c acc

    @pl.when(b == nb - 1)
    def _finalize():
        # D_c / (N_c**1.5 + 1e-10), clamp, mean over classes.
        ratio = jnp.clip(acc_ref[...] * inv_npow_ref[...], 1e-12, 1.0e12)
        loss_ref[0, 0] = jnp.sum(ratio) / jnp.float32(C)


def nc1_loss_v4_cosine(x, means, labels, occurrence, *, block_b=128):
    """
    x:          (B, D) float32 features
    means:      (C, D) float32 class means (the learnable parameter)
    labels:     (B,)   int    ground-truth labels
    occurrence: (C,)   per-class counts over the whole training set
    returns (loss_scalar, means) -- matching the PyTorch module's forward.
    """
    B, D = x.shape
    C, D2 = means.shape
    assert D == D2

    block_b = max(8, min(block_b, ((B + 7) // 8) * 8))
    # Pad the batch to a multiple of the batch tile; padded rows get label -1
    # (they never match a class, so they contribute exactly 0).
    nb = pl.cdiv(B, block_b)
    Bp = nb * block_b
    labels_i32 = labels.astype(jnp.int32)
    if Bp != B:
        x = jnp.pad(x, ((0, Bp - B), (0, 0)))
        labels_i32 = jnp.pad(labels_i32, (0, Bp - B), constant_values=-1)
    labels2d = labels_i32.reshape(Bp, 1)

    occ = occurrence.astype(jnp.float32)
    n2d = occ.reshape(1, C)
    # Constant across training steps -> hoisted out of the kernel.
    inv_npow = (1.0 / (occ ** 1.5 + 1e-10)).reshape(1, C)

    loss = pl.pallas_call(
        _nc1_cosine_kernel,
        out_shape=jax.ShapeDtypeStruct((1, 1), jnp.float32),
        grid_spec=pltpu.PrefetchScalarGridSpec(
            num_scalar_prefetch=0,
            grid=(nb,),
            in_specs=[
                pl.BlockSpec((block_b, D), lambda b: (b, 0)),   # x: streamed
                pl.BlockSpec((C, D), lambda b: (0, 0)),         # means: resident
                pl.BlockSpec((block_b, 1), lambda b: (b, 0)),   # labels
                pl.BlockSpec((1, C), lambda b: (0, 0)),         # occurrence
                pl.BlockSpec((1, C), lambda b: (0, 0)),         # 1/(N**1.5+eps)
            ],
            out_specs=pl.BlockSpec(memory_space=pltpu.MemorySpace.SMEM),
            scratch_shapes=[
                pltpu.VMEM((C, D), jnp.float32),   # normalized means (computed once)
                pltpu.VMEM((1, C), jnp.float32),   # per-class D_c accumulator
            ],
        ),
        compiler_params=pltpu.CompilerParams(
            dimension_semantics=("arbitrary",),   # batch axis carries the accumulator
        ),
    )(x, means, labels2d, n2d, inv_npow)

    return loss[0, 0], means


def _reference(x, means, labels, occurrence):
    # Plain-JAX port of the exact PyTorch formula (HIGHEST precision matmul so
    # the check is against true-f32 numerics).
    x_n = x / (jnp.linalg.norm(x, axis=1, keepdims=True) + 1e-10)
    m_n = means / (jnp.linalg.norm(means, axis=1, keepdims=True) + 1e-10)
    cos = jax.lax.dot_general(x_n, m_n, (((1,), (1,)), ((), ())),
                              precision=jax.lax.Precision.HIGHEST)
    distmat = 1.0 - cos
    B, C = distmat.shape
    mask = (labels[:, None] == jnp.arange(C)[None, :]).astype(jnp.float32)
    mask2 = (occurrence[None, :] > 0).astype(jnp.float32)
    Dsum = jnp.sum(distmat * mask * mask2, axis=0)
    Npow = occurrence ** 1.5 + 1e-10
    return jnp.sum(jnp.clip(Dsum / Npow, 1e-12, 1e12)) / C


if __name__ == "__main__":
    num_classes = 10
    feat_dim = 128      # module default feat_dim
    batch_size = 16     # 2 batch tiles of 8 -> exercises the pipelined grid

    key = jax.random.PRNGKey(0)
    k_means, k_x, k_lab = jax.random.split(key, 3)

    # stands in for nn.Parameter(torch.randn(num_classes, feat_dim))
    means = jax.random.normal(k_means, (num_classes, feat_dim), dtype=jnp.float32)
    x = jax.random.normal(k_x, (batch_size, feat_dim), dtype=jnp.float32)
    labels = jax.random.randint(k_lab, (batch_size,), 0, num_classes, dtype=jnp.int32)
    # occurrence_list from the training set (includes zero-count classes)
    occurrence = jnp.array([5, 0, 3, 10, 1, 0, 7, 2, 4, 6], dtype=jnp.float32)

    loss, means_out = nc1_loss_v4_cosine(x, means, labels, occurrence, block_b=8)
    jax.block_until_ready(loss)
    jax.block_until_ready(means_out)

    ref = _reference(x, means, labels, occurrence)
    assert jnp.allclose(loss, ref, rtol=1e-4, atol=1e-6), (loss, ref)

    print("KERNEL_OK")
</pallas_src>

<mosaic_0001>
module attributes {stable_mosaic.version = 11 : i64} {
  func.func @_nc1_cosine_kernel(%arg0: i32, %arg1: memref<8x128xf32, #tpu.memory_space<vmem>>, %arg2: memref<10x128xf32, #tpu.memory_space<vmem>>, %arg3: memref<8x1xi32, #tpu.memory_space<vmem>>, %arg4: memref<1x10xf32, #tpu.memory_space<vmem>>, %arg5: memref<1x10xf32, #tpu.memory_space<vmem>>, %arg6: memref<1x1xf32, #tpu.memory_space<smem>>, %arg7: memref<10x128xf32, #tpu.memory_space<vmem>>, %arg8: memref<1x10xf32, #tpu.memory_space<vmem>>) attributes {dimension_semantics = [#tpu.dimension_semantics<arbitrary>], iteration_bounds = array<i64: 2>, scalar_prefetch = 0 : i64, scratch_operands = 2 : i64, tpu.core_type = #tpu.core_type<tc>, window_params = [{transform_indices = @transform_0, window_bounds = array<i64: 8, 128>}, {pipeline_mode = #tpu.pipeline_mode<synchronous>, transform_indices = @transform_1, window_bounds = array<i64: 10, 128>}, {transform_indices = @transform_2, window_bounds = array<i64: 8, 1>}, {pipeline_mode = #tpu.pipeline_mode<synchronous>, transform_indices = @transform_3, window_bounds = array<i64: 1, 10>}, {pipeline_mode = #tpu.pipeline_mode<synchronous>, transform_indices = @transform_4, window_bounds = array<i64: 1, 10>}, {transform_indices = @transform_5, window_bounds = array<i64: 1, 1>}]} {
    %c0_i32 = arith.constant 0 : i32
    %0 = arith.cmpi eq, %arg0, %c0_i32 : i32
    %1 = arith.extui %0 : i1 to i32
    %c0_i32_0 = arith.constant 0 : i32
    %2 = arith.cmpi ne, %1, %c0_i32_0 : i32
    scf.if %2 {
      %c0_20 = arith.constant 0 : index
      %c0_21 = arith.constant 0 : index
      %37 = vector.load %arg2[%c0_20, %c0_21] : memref<10x128xf32, #tpu.memory_space<vmem>>, vector<10x128xf32>
      %38 = arith.mulf %37, %37 : vector<10x128xf32>
      %cst_22 = arith.constant dense<0.000000e+00> : vector<10xf32>
      %39 = vector.multi_reduction <add>, %38, %cst_22 [1] : vector<10x128xf32> to vector<10xf32>
      %40 = vector.shape_cast %39 : vector<10xf32> to vector<10x1xf32>
      %41 = math.sqrt %40 : vector<10x1xf32>
      %cst_23 = arith.constant 1.000000e-10 : f32
      %42 = vector.broadcast %cst_23 : f32 to vector<10x1xf32>
      %43 = arith.addf %41, %42 : vector<10x1xf32>
      %cst_24 = arith.constant 1.000000e+00 : f32
      %44 = vector.broadcast %cst_24 : f32 to vector<10x1xf32>
      %45 = arith.divf %44, %43 : vector<10x1xf32>
      %46 = vector.broadcast %45 : vector<10x1xf32> to vector<10x128xf32>
      %47 = arith.mulf %37, %46 : vector<10x128xf32>
      %c0_25 = arith.constant 0 : index
      %c0_26 = arith.constant 0 : index
      %48 = vector.load %arg7[%c0_25, %c0_26] : memref<10x128xf32, #tpu.memory_space<vmem>>, vector<10x128xf32>
      tpu.vector_store %arg7[%c0_25, %c0_26], %47 {strides = array<i32>} : memref<10x128xf32, #tpu.memory_space<vmem>>, vector<10x128xf32>,
      %cst_27 = arith.constant 0.000000e+00 : f32
      %49 = vector.broadcast %cst_27 : f32 to vector<1x10xf32>
      %c0_28 = arith.constant 0 : index
      %c0_29 = arith.constant 0 : index
      %50 = vector.load %arg8[%c0_28, %c0_29] : memref<1x10xf32, #tpu.memory_space<vmem>>, vector<1x10xf32>
      tpu.vector_store %arg8[%c0_28, %c0_29], %49 {strides = array<i32>} : memref<1x10xf32, #tpu.memory_space<vmem>>, vector<1x10xf32>,
    } else {
    }
    %c0 = arith.constant 0 : index
    %c0_1 = arith.constant 0 : index
    %3 = vector.load %arg1[%c0, %c0_1] : memref<8x128xf32, #tpu.memory_space<vmem>>, vector<8x128xf32>
    %c0_2 = arith.constant 0 : index
    %c0_3 = arith.constant 0 : index
    %4 = vector.load %arg7[%c0_2, %c0_3] : memref<10x128xf32, #tpu.memory_space<vmem>>, vector<10x128xf32>
    %cst = arith.constant dense<0.000000e+00> : vector<8x10xf32>
    %5 = tpu.matmul %3, %4, %cst {dimension_numbers = #tpu.dot_dimension_numbers<[1], [1], [0], [0], [0, 0, 1, 0], [], []>} : vector<8x128xf32>, vector<10x128xf32>, vector<8x10xf32> -> vector<8x10xf32>
    %6 = arith.mulf %3, %3 : vector<8x128xf32>
    %cst_4 = arith.constant dense<0.000000e+00> : vector<8xf32>
    %7 = vector.multi_reduction <add>, %6, %cst_4 [1] : vector<8x128xf32> to vector<8xf32>
    %8 = vector.shape_cast %7 : vector<8xf32> to vector<8x1xf32>
    %9 = math.sqrt %8 : vector<8x1xf32>
    %cst_5 = arith.constant 1.000000e-10 : f32
    %10 = vector.broadcast %cst_5 : f32 to vector<8x1xf32>
    %11 = arith.addf %9, %10 : vector<8x1xf32>
    %cst_6 = arith.constant 1.000000e+00 : f32
    %12 = vector.broadcast %cst_6 : f32 to vector<8x1xf32>
    %13 = arith.divf %12, %11 : vector<8x1xf32>
    %14 = tpu.iota {dimensions = array<i32: 1>} : vector<8x10xi32>
    %c0_7 = arith.constant 0 : index
    %c0_8 = arith.constant 0 : index
    %15 = vector.load %arg3[%c0_7, %c0_8] : memref<8x1xi32, #tpu.memory_space<vmem>>, vector<8x1xi32>
    %16 = vector.broadcast %15 : vector<8x1xi32> to vector<8x10xi32>
    %17 = arith.cmpi eq, %16, %14 : vector<8x10xi32>
    %c0_9 = arith.constant 0 : index
    %c0_10 = arith.constant 0 : index
    %18 = vector.load %arg4[%c0_9, %c0_10] : memref<1x10xf32, #tpu.memory_space<vmem>>, vector<1x10xf32>
    %cst_11 = arith.constant 0.000000e+00 : f32
    %19 = vector.broadcast %cst_11 : f32 to vector<1x10xf32>
    %20 = arith.cmpf ogt, %18, %19 : vector<1x10xf32>
    %21 = vector.broadcast %20 : vector<1x10xi1> to vector<8x10xi1>
    %22 = arith.andi %17, %21 : vector<8x10xi1>
    %23 = vector.broadcast %13 : vector<8x1xf32> to vector<8x10xf32>
    %24 = arith.mulf %5, %23 : vector<8x10xf32>
    %cst_12 = arith.constant 1.000000e+00 : f32
    %25 = vector.broadcast %cst_12 : f32 to vector<8x10xf32>
    %26 = arith.subf %25, %24 : vector<8x10xf32>
    %cst_13 = arith.constant 0.000000e+00 : f32
    %27 = vector.broadcast %cst_13 : f32 to vector<8x10xf32>
    %28 = arith.select %22, %26, %27 : vector<8x10xi1>, vector<8x10xf32>
    %c0_14 = arith.constant 0 : index
    %c0_15 = arith.constant 0 : index
    %29 = vector.load %arg8[%c0_14, %c0_15] : memref<1x10xf32, #tpu.memory_space<vmem>>, vector<1x10xf32>
    %cst_16 = arith.constant dense<0.000000e+00> : vector<10xf32>
    %30 = vector.multi_reduction <add>, %28, %cst_16 [0] : vector<8x10xf32> to vector<10xf32>
    %31 = vector.shape_cast %30 : vector<10xf32> to vector<1x10xf32>
    %32 = arith.addf %29, %31 : vector<1x10xf32>
    %c0_17 = arith.constant 0 : index
    %c0_18 = arith.constant 0 : index
    %33 = vector.load %arg8[%c0_17, %c0_18] : memref<1x10xf32, #tpu.memory_space<vmem>>, vector<1x10xf32>
    tpu.vector_store %arg8[%c0_17, %c0_18], %32 {strides = array<i32>} : memref<1x10xf32, #tpu.memory_space<vmem>>, vector<1x10xf32>,
    %c1_i32 = arith.constant 1 : i32
    %34 = arith.cmpi eq, %arg0, %c1_i32 : i32
    %35 = arith.extui %34 : i1 to i32
    %c0_i32_19 = arith.constant 0 : i32
    %36 = arith.cmpi ne, %35, %c0_i32_19 : i32
    scf.if %36 {
      %c0_20 = arith.constant 0 : index
      %c0_21 = arith.constant 0 : index
      %37 = vector.load %arg8[%c0_20, %c0_21] : memref<1x10xf32, #tpu.memory_space<vmem>>, vector<1x10xf32>
      %c0_22 = arith.constant 0 : index
      %c0_23 = arith.constant 0 : index
      %38 = vector.load %arg5[%c0_22, %c0_23] : memref<1x10xf32, #tpu.memory_space<vmem>>, vector<1x10xf32>
      %39 = arith.mulf %37, %38 : vector<1x10xf32>
      %cst_24 = arith.constant 9.99999996E-13 : f32
      %cst_25 = arith.constant 9.99999995E+11 : f32
      %40 = vector.broadcast %cst_24 : f32 to vector<1x10xf32>
      %41 = arith.maximumf %40, %39 : vector<1x10xf32>
      %42 = vector.broadcast %cst_25 : f32 to vector<1x10xf32>
      %43 = arith.minimumf %42, %41 : vector<1x10xf32>
      %44 = vector.shape_cast %43 : vector<1x10xf32> to vector<1x1x10xf32>
      %cst_26 = arith.constant dense<0.000000e+00> : vector<1xf32>
      %45 = vector.multi_reduction <add>, %44, %cst_26 [1, 2] : vector<1x1x10xf32> to vector<1xf32>
      %46 = vector.shape_cast %45 : vector<1xf32> to vector<1x1x1xf32>
      %47 = vector.extract %46[0, 0, 0] : f32 from vector<1x1x1xf32>
      %cst_27 = arith.constant 1.000000e+01 : f32
      %48 = arith.divf %47, %cst_27 : f32
      %c0_28 = arith.constant 0 : index
      %c0_29 = arith.constant 0 : index
      %49 = memref.load %arg6[%c0_28, %c0_29] : memref<1x1xf32, #tpu.memory_space<smem>>
      memref.store %48, %arg6[%c0_28, %c0_29] : memref<1x1xf32, #tpu.memory_space<smem>>
    } else {
    }
    return
  }
  func.func @transform_0(%arg0: i32) -> (i32, i32) {
    %c0_i32 = arith.constant 0 : i32
    %c0_i32_0 = arith.constant 0 : i32
    return %arg0, %c0_i32 : i32, i32
  }
  func.func @transform_1(%arg0: i32) -> (i32, i32) {
    %c0_i32 = arith.constant 0 : i32
    %c0_i32_0 = arith.constant 0 : i32
    %c0_i32_1 = arith.constant 0 : i32
    return %c0_i32, %c0_i32_0 : i32, i32
  }
  func.func @transform_2(%arg0: i32) -> (i32, i32) {
    %c0_i32 = arith.constant 0 : i32
    %c0_i32_0 = arith.constant 0 : i32
    return %arg0, %c0_i32 : i32, i32
  }
  func.func @transform_3(%arg0: i32) -> (i32, i32) {
    %c0_i32 = arith.constant 0 : i32
    %c0_i32_0 = arith.constant 0 : i32
    %c0_i32_1 = arith.constant 0 : i32
    return %c0_i32, %c0_i32_0 : i32, i32
  }
  func.func @transform_4(%arg0: i32) -> (i32, i32) {
    %c0_i32 = arith.constant 0 : i32
    %c0_i32_0 = arith.constant 0 : i32
    %c0_i32_1 = arith.constant 0 : i32
    return %c0_i32, %c0_i32_0 : i32, i32
  }
  func.func @transform_5(%arg0: i32) -> (i32, i32) {
    %c0_i32 = arith.constant 0 : i32
    %c0_i32_0 = arith.constant 0 : i32
    %c0_i32_1 = arith.constant 0 : i32
    return %c0_i32, %c0_i32_0 : i32, i32
  }
}

</mosaic_0001>

<bundles_post_ra>
// kernel: tpu_custom_call.1
= control target key start
LH: loop header
LB: loop body
LE: loop exit
PB: predicated region body
PF: predicated region fallthrough
CT: control target
= control target key end

     0   :  { %10 = vsyncpa [#allocation5], 0  ;;  %s745_s0 = inlined_call_operand.vmem [shape: f32[16,128], index: 0, kind: input, shape index: {}]   ;;  %s746_s1 = inlined_call_operand.hbm [shape: f32[10,128], index: 1, kind: input, shape index: {}]   ;;  %s747_s2 = inlined_call_operand.vmem [shape: s32[16,1], index: 2, kind: input, shape index: {}]   ;;  %s748_s3 = inlined_call_operand.vmem [shape: f32[1,10], index: 3, kind: input, shape index: {}]   ;;  %s749_s4 = inlined_call_operand.vmem [shape: f32[1,10], index: 4, kind: input, shape index: {}]   ;;  %s750_s5 = inlined_call_operand.hbm [shape: f32[1,1], index: 5, kind: output, shape index: {}]  }
   0x1   :  { %11 = vsyncpa [#allocation6], 0  ;;  %s660_s18 = smov 0  }
   0x2 LB: > { %s666_s19 = sadd.s32 4294967295, %s619_s18   ;;  %p491_p0 = scmp.ge.s32.totalorder %s619_s18, 1  ;;  %s619_s18 = sphi %s660_s18, %s17_s18  }
   0x3   : > { %p158_p1 = scmp.lt.s32.totalorder %s619_s18, 3  ;;  %s621_s20 = smov [#allocation4]  }
   0x4   : > { %s170_s21 = sshll.u32 %s621_s20, 4  ;;  %p751_p4 = scmp.eq.s32.totalorder %s666_s19, 0  ;;  %s171_s21 = int_to_ptr.vmem [resolvable:$true] %s170_s21 }
   0x5   : > { %p671_p3 = pnand %p491_p0, %p158_p1  ;;  %s565_s26 = scalar_lea.hbm %s746_s1, 256 }
   0x6   : > { %p566_p7 = scmp.ne.s32.totalorder %s746_s1, %s565_s26  ;;  %p572_p11 = scmp.lt.u32.totalorder %s565_s26, %s746_s1 }
   0x7   : > { %s753_s22 = scalar_select %p671_p3, 1, 0 }
   0x8   : > { %p527_p5 = pneg %p671_p3 }
   0xa   : > { %p680_p6 = pnand %p751_p4, %p527_p5 }
   0xc   : > { %p567_p8 = pneg %p680_p6 }
   0xe   : > { %p568_p9 = pnand %p567_p8, %p566_p7 }
  0x10   : > { %p569_p10 = pneg %p568_p9 }
  0x12   : > { %p574_p12 = pnand %p572_p11, %p569_p10 }
  0x14   : > { %577 = shalt.err (!%p574_p12)
}
  0x15   : > { %s578_s6 = scalar_lea.vmem %s171_s21, 256  ;;  %p586_p5 = scmp.lt.s32.totalorder %s171_s21, %s171_s21 }
  0x16   : > { %p579_p13 = scmp.ne.s32.totalorder %s171_s21, %s578_s6  ;;  %p587_p2 = scmp.lt.s32.totalorder %s578_s6, %s578_s6 }
  0x18   : > { %p581_p0 = pnand %p579_p13, %p567_p8  ;;  %p588_p4 = por %p587_p2, %p586_p5 }
  0x1a   : > { %p582_p1 = pneg %p581_p0 }
  0x1c   : > { %p589_p3 = pnand %p588_p4, %p582_p1 }
  0x1e   : > { %592 = shalt.err (!%p589_p3)
}
  0x1f   : > { %s622_s7 = smov 128   ;;  %s623_s8 = smov 8  }
  0x20   : > { %530 = dma.hbm_to_vmem [thread:$0]  (!%p680_p6), %s746_s1, 256, %s171_s21, [#allocation5], %s622_s7, %s622_s7, %s623_s8  }
  0x21   : > { %p755_p7 = scmp.ne.s32.totalorder %s753_s22, 0 }
  0x22   : > { %p756_p9 = scmp.eq.s32.totalorder (!%p755_p7), %s666_s19, 0 }
  0x23   : > { %206 = sbr.rel (%p755_p7) target bundleno = 710 (0x2c6), region = 40 }
  0x2a   : > { %610 = dma.done.wait (%p756_p9), [#allocation5], 256   ;;  %p757_p8 = pmov %p756_p9 }
  0x2b   : > { %p232_p2 = scmp.lt.s32.totalorder %s666_s19, 1  ;;  %p758_p3 = scmp.ne.s32.totalorder %s666_s19, 0 }
  0x2c   : > { %612 = vsyncadd (%p757_p8), [#allocation5], 4294967040  ;;  %v244_v0 = vld [vmem:[#allocation4] sm:$0xff] (!%p758_p3)  ;;  %v245_v1 = vld [vmem:[#allocation4 + $0x8] sm:$0x3] (!%p758_p3)  ;;  %vm250_vm0 = vcmask (!%p758_p3), 1041408  }
  0x2d   : > { %s233_s11 = scalar_select %p232_p2, %s666_s19, 1 }
  0x2e   : > { %243 = sbr.rel (%p758_p3) target bundleno = 225 (0xe1), region = 48  ;;  %v246_v2 = vmul.f32 (!%p758_p3), %v244_v0, %v244_v0  ;;  %v247_v3 = vmul.f32 (!%p758_p3), %v245_v1, %v245_v1  ;;  %vm278_vm1 = vcmask (!%p758_p3), 73728   ;;  %v624_v5 = vmov (!%p758_p3), 0.0  }
  0x2f   : > { %s496_s12 = sshll.u32 %s233_s11, 3  ;;  %279 = vst.msk [vmem:[#allocation3] sm:$0x1] (!%p758_p3), %vm278_vm1, %v624_v5 }
  0x30   : > { %s711_s15 = scalar_lea.vmem %s745_s0, %s496_s12  ;;  %s716_s20 = scalar_lea.vmem %s747_s2, %s496_s12  ;;  %248 = vadd.xlane.f32.xlu0 (!%p758_p3), %v246_v2  ;;  %v251_v4 = vsel (!%p758_p3), %vm250_vm0, %v247_v3, 0.0 }
  0x34   : > { %252 = vadd.xlane.f32.xlu0 (!%p758_p3), %v251_v4 }
  0xbd   : > { %v249_v6 = vpop.xlane.xlu0 %248 }
  0xbe   : > { %552 = vrsqrt.f32 %v249_v6  ;;  %vm256_vm2 = vcmp.eq.f32.partialorder %v249_v6, inf  ;;  %v259_v10 = vand.u32 2147483648, %v249_v6  ;;  %vm258_vm3 = vcmp.eq.f32.partialorder %v249_v6, 0.0 }
  0xc1   : > { %v253_v7 = vpop.xlane.xlu0 %252 }
  0xc2   : > { %554 = vrsqrt.f32 %v253_v7  ;;  %vm263_vm4 = vcmp.eq.f32.partialorder %v253_v7, inf  ;;  %v266_v16 = vand.u32 2147483648, %v253_v7  ;;  %vm265_vm5 = vcmp.eq.f32.partialorder %v253_v7, 0.0 }
  0xc8   : > { %v553_v8 = vpop.eup %552 }
  0xc9   : > { %v255_v9 = vmul.f32 %v553_v8, %v249_v6 }
  0xcb   : > { %v257_v11 = vsel %vm256_vm2, %v249_v6, %v255_v9 }
  0xcc   : > { %v555_v12 = vpop.eup %554  ;;  %v260_v13 = vsel %vm258_vm3, %v259_v10, %v257_v11 }
  0xcd   : > { %v268_v14 = vadd.f32 1e-10, %v260_v13  ;;  %v262_v15 = vmul.f32 %v555_v12, %v253_v7 }
  0xcf   : > { %556 = vrcp.f32 %v268_v14  ;;  %v264_v17 = vsel %vm263_vm4, %v253_v7, %v262_v15 }
  0xd0   : > { %v267_v18 = vsel %vm265_vm5, %v266_v16, %v264_v17 }
  0xd1   : > { %v269_v19 = vadd.f32 1e-10, %v267_v18 }
  0xd3   : > { %558 = vrcp.f32 %v269_v19 }
  0xd9   : > { %v557_v20 = vpop.eup %556 }
  0xda   : > { %v274_v21 = vmul.f32 %v557_v20, %v244_v0 }
  0xdc   : > { %276 = vst [vmem:[#allocation2] sm:$0xff] %v274_v21 }
  0xdd   : > { %v559_v22 = vpop.eup %558 }
  0xde   : > { %v275_v23 = vmul.f32 %v559_v22, %v245_v1 }
  0xe0   : > { %277 = vst [vmem:[#allocation2 + $0x8] sm:$0x3] %v275_v23 }
  0xe1 PF: > { %v625_v26 = vmov 0.0|0.0   ;;  %vm626_vm6 = vmmov 0   ;;  %v627_v28 = vmov 0.0   ;;  %v280_v29 = vld [vmem:[%s711_s15] sm:$0xff]  ;;  %v628_v31 = vmov 0   ;;  %p499_p4 = scmp.ne.s32.totalorder %s666_s19, 1 }
  0xe2   : > { %514 = vmatprep.subr.bf16.mxu0 %v625_v26  ;;  %511 = vmatprep.mubr.msk.f32.mxu0 %vm626_vm6, %v627_v28  ;;  %v353_v30 = vmul.f32 %v280_v29, %v280_v29  ;;  %v368_v32 = vld [vmem:[%s716_s20] sm:$0xff]  ;;  %v366_v38 = vlaneseq  ;;  %vm386_vm13 = vcmask 80896   ;;  %v385_v60 = vld [vmem:[#allocation3] sm:$0x1]  ;;  %vm395_vm14 = vcmask 73728  }
  0xe3   : > { %v281_v24 = vld [vmem:[#allocation2] sm:$0xff]  ;;  %560 = vset.pattern.permute.xlu0 %v628_v31 }
  0xe4   : > { %354 = vadd.xlane.f32.xlu0 %v353_v30  ;;  %v373_v40 = vld [vmem:[%s748_s3] sm:$0x1]  ;;  %v377_v42 = vshrl.u32 %v366_v38, 7  ;;  %v367_v46 = vand.u32 127, %v366_v38 }
  0xe5   : > { %vm374_vm9 = vcmp.gt.f32.partialorder %v373_v40, 0.0  ;;  %v402_v0 = vld [vmem:[%s749_s4] sm:$0x1] (!%p499_p4) }
  0xe6   : > { %v378_v43 = vsub.s32 0, %v377_v42  ;;  %v375_v44 = vsel %vm374_vm9, 1, %v628_v31 }
  0xe7   : > { %v282_v25 = vld [vmem:[#allocation2 + $0x8] sm:$0x3] }
  0xe8   : > { %v515_v27 = vpack.c.bf16 %v282_v25, %v281_v24  ;;  %v379_v45 = vrot.slane %v375_v44, %v378_v43 }
  0xea   : > { %516 = vmatpush3.bf16.xpose.msra.mxu0 %v515_v27  ;;  %vm380_vm10 = vcmp.eq.s32.totalorder %v379_v45, 1 }
  0xf1   : > { %512 = vmatmul.mubr.f32.vlgmr.msra.gmra.mrb[0].mxu0 %v280_v29 }
  0xfa   : > { %370 = vperm.xlu0 %560, %v368_v32  }
 0x171   : > { %v355_v33 = vpop.xlane.xlu0 %354 }
 0x172   : > { %561 = vrsqrt.f32 %v355_v33  ;;  %vm358_vm7 = vcmp.eq.f32.partialorder %v355_v33, inf  ;;  %v361_v36 = vand.u32 2147483648, %v355_v33  ;;  %vm360_vm8 = vcmp.eq.f32.partialorder %v355_v33, 0.0 }
 0x179   : > { %v371_v47 = vpop.permute.xlu0 %370 }
 0x17a   : > { %vm372_vm11 = vcmp.eq.s32.totalorder %v371_v47, %v367_v46 }
 0x17b   : > { %vm381_vm12 = vmand %vm372_vm11, %vm380_vm10 }
 0x17c   : > { %v562_v34 = vpop.eup %561 }
 0x17d   : > { %v357_v35 = vmul.f32 %v562_v34, %v355_v33 }
 0x17f   : > { %v359_v37 = vsel %vm358_vm7, %v355_v33, %v357_v35 }
 0x180   : > { %v362_v39 = vsel %vm360_vm8, %v361_v36, %v359_v37 }
 0x181   : > { %v363_v41 = vadd.f32 1e-10, %v362_v39 }
 0x183   : > { %563 = vrcp.f32 %v363_v41 }
 0x18d   : > { %v564_v48 = vpop.eup %563 }
 0x1c4   : > { %v349_v49 = vpop.f32.mrb[0].mxu0 }
 0x1c5   : > { %v382_v50 = vmul.f32 %v564_v48, %v349_v49  ;;  %v513_v51 = vpop.f32.mrb[1].mxu0 }
 0x1c7   : > { %v383_v52 = vsub.f32 1.0, %v382_v50 }
 0x1c9   : > { %v384_v53 = vsel %vm381_vm12, %v383_v52, 0.0 }
 0x1ca   : > { %v387_v54 = vsel %vm386_vm13, %v384_v53, 0.0 }
 0x1cb   : > { %v388_v55 = vrot.slane %v387_v54, 4 }
 0x1cd   : > { %v389_v56 = vadd.f32 %v388_v55, %v387_v54 }
 0x1cf   : > { %v390_v57 = vrot.slane %v389_v56, 2 }
 0x1d1   : > { %v391_v58 = vadd.f32 %v390_v57, %v389_v56 }
 0x1d3   : > { %v392_v59 = vrot.slane %v391_v58, 1  ;;  %400 = sbr.rel (%p499_p4) target bundleno = 695 (0x2b7), region = 52 }
 0x1d5   : > { %v393_v61 = vadd.f32 %v392_v59, %v391_v58 }
 0x1d7   : > { %v394_v62 = vadd.f32 %v393_v61, %v385_v60 }
 0x1d9   : > { %396 = vst.msk [vmem:[#allocation3] sm:$0x1] %vm395_vm14, %v394_v62 }
 0x1e0   : > { %v401_v63 = vld [vmem:[#allocation3] sm:$0x1] }
 0x1e1   : > { %v403_v1 = vmul.f32 %v402_v0, %v401_v63 }
 0x1e3   : > { %v404_v2 = vmax.f32 %v403_v1, 1e-12 }
 0x1e5   : > { %v405_v3 = vmin.f32 %v404_v2, 1e+12 }
 0x1e7   : > { %v406_v4 = vsel %vm395_vm14, %v405_v3, 0.0 }
 0x1e8   : > { %407 = vadd.xlane.f32.xlu0 %v406_v4 }
 0x275   : > { %v408_v5 = vpop.xlane.xlu0 %407 }
 0x276   : > { %v409_v6 = vrot.slane %v408_v5, 4 }
 0x278   : > { %v410_v7 = vadd.f32 %v409_v6, %v408_v5 }
 0x27a   : > { %v411_v8 = vrot.slane %v410_v7, 2 }
 0x27c   : > { %v412_v9 = vadd.f32 %v411_v8, %v410_v7 }
 0x27e   : > { %v413_v10 = vrot.slane %v412_v9, 1 }
 0x280   : > { %v414_v11 = vadd.f32 %v413_v10, %v412_v9 }
 0x282   : > { %517 = vpush %v414_v11 }
 0x2b3   : > { %s518_s25 = spop %517 }
 0x2b4   : > { %s418_s26 = smul.f32 0.1, %s518_s25 }
 0x2b6   : > { %420 = sst [smem:[#allocation7]] %s418_s26 }
 0x2b7 PF: > { %p533_p6 = scmp.eq.s32.totalorder %s666_s19, 1  ;;  %s593_s29 = scalar_lea.hbm %s750_s5, 16 }
 0x2b8   : > { %p594_p10 = scmp.ne.s32.totalorder %s750_s5, %s593_s29  ;;  %p599_p13 = scmp.lt.u32.totalorder %s593_s29, %s750_s5 }
 0x2ba   : > { %p595_p11 = pnand %p594_p10, %p533_p6 }
 0x2bc   : > { %p596_p12 = pneg %p595_p11 }
 0x2be   : > { %p601_p0 = pnand %p599_p13, %p596_p12 }
 0x2c0   : > { %604 = shalt.err (!%p601_p0)
}
 0x2c1   : > { %s629_s9 = smov [#allocation7]  }
 0x2c2   : > { %524 = dma.smem_to_hbm (%p533_p6), %s629_s9, 16, %s750_s5, [#allocation6]  }
 0x2c3   : > { %614 = dma.done.wait (%p533_p6), [#allocation6], 16  }
 0x2c4   : > { %616 = vsyncadd (%p533_p6), [#allocation6], 4294967280 }
 0x2c5   : > { %434 = sfence }
 0x2c6 PF: > { %s17_s18 = sadd.s32 1, %s619_s18  }
 0x2c7   : > { %p14_p1 = scmp.ge.s32.totalorder %s17_s18, 4  }
 0x2c9   :  { %16 = sbr.rel (!%p14_p1) target bundleno = 2 (0x2), region = 84 }
 0x2d0   :  { %440 = vsyncpa [#allocation5], 1 }
 0x2d1   :  { %442 = vsyncpa [#allocation5 + $0x1], 1 }
 0x2d2   :  { %443 = vsyncpa [#allocation6], 1 }
 0x2d3   :  { %445 = vsyncpa [#allocation6 + $0x1], 1 }

</bundles_post_ra>
